<compile_context>
chip_gen: v7x
topology: tpu7x:2x2x1
jax: 0.10.0
libtpu: 0.0.40
codegen_flags: <defaults>
</compile_context>

<pallas_src>
import math

import jax
import jax.numpy as jnp
from jax.experimental import pallas as pl
from jax.experimental.pallas import tpu as pltpu

_HIDDEN = 100
_LANE = 128
_NEG = -1e30  # effectively -inf for padded action lanes


def _round_up(x, m):
    return (x + m - 1) // m * m


def _mlp_softmax_kernel(x_ref, w1_ref, b1_ref, w2_ref, b2_ref, probs_ref, logits_ref):
    x = x_ref[...].astype(w1_ref.dtype)                                    # (tb, S)
    h = jnp.dot(x, w1_ref[...], preferred_element_type=jnp.float32)        # (tb, 128)
    h = jnp.maximum(h + b1_ref[...].astype(jnp.float32), 0.0)              # ReLU
    logits = jnp.dot(h.astype(w2_ref.dtype), w2_ref[...],
                     preferred_element_type=jnp.float32)                   # (tb, 128)
    logits = logits + b2_ref[...].astype(jnp.float32)                      # padded lanes -> -1e30
    logits_ref[...] = logits.astype(logits_ref.dtype)
    # Numerically stable softmax over the (padded, lane-dense) action axis.
    # Padded lanes underflow to exactly 0 probability.
    m = jnp.max(logits, axis=-1, keepdims=True)
    e = jnp.exp(logits - m)
    s = jnp.sum(e, axis=-1, keepdims=True)
    probs_ref[...] = (e * pl.reciprocal(s, approx=True)).astype(probs_ref.dtype)


def mlp_softmax(state, w1, b1, w2, b2, action_dim, *, batch_tile=256,
                compute_dtype=jnp.float32):
    """Runs the padded MLP+softmax kernel. Returns (probs, logits), each (B, action_dim) f32."""
    B, S = state.shape
    Hp = w1.shape[1]          # padded hidden (128)
    Ap = w2.shape[1]          # padded action width (128)

    tb = min(batch_tile, _round_up(B, 8))
    Bp = _round_up(B, tb)
    if Bp != B:
        state = jnp.pad(state, ((0, Bp - B), (0, 0)))

    # Optional bf16 MXU operands (v6e/v7x); biases / accumulation stay f32.
    state = state.astype(compute_dtype)
    w1 = w1.astype(compute_dtype)
    w2 = w2.astype(compute_dtype)

    row = lambda i: (i, 0)        # batch-tiled operands
    pinned = lambda i: (0, 0)     # weights/biases resident in VMEM across the grid

    probs, logits = pl.pallas_call(
        _mlp_softmax_kernel,
        out_shape=(jax.ShapeDtypeStruct((Bp, Ap), jnp.float32),
                   jax.ShapeDtypeStruct((Bp, Ap), jnp.float32)),
        grid=(Bp // tb,),
        in_specs=[
            pl.BlockSpec((tb, S), row),
            pl.BlockSpec((S, Hp), pinned),
            pl.BlockSpec((1, Hp), pinned),
            pl.BlockSpec((Hp, Ap), pinned),
            pl.BlockSpec((1, Ap), pinned),
        ],
        out_specs=(pl.BlockSpec((tb, Ap), row),
                   pl.BlockSpec((tb, Ap), row)),
        compiler_params=pltpu.CompilerParams(
            dimension_semantics=("parallel",)),
    )(state, w1, b1, w2, b2)

    return probs[:B, :action_dim], logits[:B, :action_dim]


class ESPolicyDiscrete:
    """JAX/Pallas port of the PyTorch ESPolicyDiscrete module."""

    def __init__(self, state_dim, action_dim, key=None):
        if key is None:
            key = jax.random.PRNGKey(0)
        k1, k2, k3, k4 = jax.random.split(key, 4)
        hidden = _HIDDEN
        hp = _round_up(hidden, _LANE)        # 100 -> 128
        ap = _round_up(action_dim, _LANE)    # A   -> 128
        # Deterministic init mimicking PyTorch's default U(-1/sqrt(fan_in), 1/sqrt(fan_in)).
        bound1 = 1.0 / math.sqrt(state_dim)
        bound2 = 1.0 / math.sqrt(hidden)
        w1 = jax.random.uniform(k1, (state_dim, hidden), jnp.float32, -bound1, bound1)
        b1 = jax.random.uniform(k2, (hidden,), jnp.float32, -bound1, bound1)
        w2 = jax.random.uniform(k3, (hidden, action_dim), jnp.float32, -bound2, bound2)
        b2 = jax.random.uniform(k4, (action_dim,), jnp.float32, -bound2, bound2)
        # Stored as (in_features, out_features_padded): kernel computes x @ W.
        # Padded hidden columns/bias are zero; padded action lanes get bias -1e30
        # so they contribute exactly zero probability after the softmax.
        self.w1 = jnp.zeros((state_dim, hp), jnp.float32).at[:, :hidden].set(w1)
        self.b1 = jnp.zeros((1, hp), jnp.float32).at[0, :hidden].set(b1)
        self.w2 = jnp.zeros((hp, ap), jnp.float32).at[:hidden, :action_dim].set(w2)
        self.b2 = jnp.full((1, ap), _NEG, jnp.float32).at[0, :action_dim].set(b2)
        self.state_dim = state_dim
        self.action_dim = action_dim
        self.hidden = hidden

    def probabilities(self, state):
        probs, _ = mlp_softmax(state, self.w1, self.b1, self.w2, self.b2, self.action_dim)
        return probs

    def forward(self, state, stochastic=True, key=None):
        probs, logits = mlp_softmax(state, self.w1, self.b1, self.w2, self.b2,
                                    self.action_dim)
        if stochastic:
            if key is None:
                key = jax.random.PRNGKey(0)
            # Categorical(pred).sample().squeeze(); sampling from logits gives the
            # identical distribution and avoids the exp->log precision loss.
            return jnp.squeeze(jax.random.categorical(key, logits, axis=-1))
        else:
            # Matches PyTorch's tensor.argmax() quirk: flat index over (B, A).
            # TODO(synk): for batch > 1 a per-row argmax (axis=-1) is probably what is intended.
            return jnp.argmax(probs)


if __name__ == "__main__":
    batch, state_dim, action_dim = 2, 16, 6

    key = jax.random.PRNGKey(0)
    k_params, k_state, k_big, k_sample = jax.random.split(key, 4)

    policy = ESPolicyDiscrete(state_dim, action_dim, key=k_params)
    state = jax.random.normal(k_state, (batch, state_dim), jnp.float32)

    # Small-batch run of the Pallas kernel.
    probs, logits = mlp_softmax(state, policy.w1, policy.b1, policy.w2, policy.b2,
                                action_dim)
    jax.block_until_ready((probs, logits))

    # Pure-JAX reference on the unpadded weights.
    w1u = policy.w1[:, :policy.hidden]
    b1u = policy.b1[:, :policy.hidden]
    w2u = policy.w2[:policy.hidden, :action_dim]
    b2u = policy.b2[:, :action_dim]
    ref_logits = jnp.maximum(state @ w1u + b1u, 0.0) @ w2u + b2u
    ref_probs = jax.nn.softmax(ref_logits, axis=-1)

    assert probs.shape == (batch, action_dim) and logits.shape == (batch, action_dim)
    assert jnp.allclose(logits, ref_logits, atol=1e-4, rtol=1e-4), "logits mismatch"
    # approx reciprocal -> slightly looser tolerance on probabilities
    assert jnp.allclose(probs, ref_probs, atol=3e-3), "probs mismatch vs reference"
    assert jnp.allclose(jnp.sum(probs, axis=-1), 1.0, atol=3e-3)

    # ES-population-sized call exercising the batch grid (multiple tiles; 2 TCs on v7x).
    big_state = jax.random.normal(k_big, (512, state_dim), jnp.float32)
    big_probs, big_logits = mlp_softmax(big_state, policy.w1, policy.b1,
                                        policy.w2, policy.b2, action_dim)
    jax.block_until_ready((big_probs, big_logits))
    ref_big = jax.nn.softmax(jnp.maximum(big_state @ w1u + b1u, 0.0) @ w2u + b2u, axis=-1)
    assert big_probs.shape == (512, action_dim)
    assert jnp.allclose(big_probs, ref_big, atol=3e-3), "batched probs mismatch"

    # Both heads of the forward pass.
    action_stoch = policy.forward(state, stochastic=True, key=k_sample)
    action_det = policy.forward(state, stochastic=False)
    jax.block_until_ready((action_stoch, action_det))
    assert int(action_det) == int(jnp.argmax(ref_probs))

    print("KERNEL_OK")
</pallas_src>

<mosaic_0001>
module attributes {stable_mosaic.version = 11 : i64} {
  func.func @_mlp_softmax_kernel(%arg0: i32, %arg1: memref<8x16xf32, #tpu.memory_space<vmem>>, %arg2: memref<16x128xf32, #tpu.memory_space<vmem>>, %arg3: memref<1x128xf32, #tpu.memory_space<vmem>>, %arg4: memref<128x128xf32, #tpu.memory_space<vmem>>, %arg5: memref<1x128xf32, #tpu.memory_space<vmem>>, %arg6: memref<8x128xf32, #tpu.memory_space<vmem>>, %arg7: memref<8x128xf32, #tpu.memory_space<vmem>>) attributes {dimension_semantics = [#tpu.dimension_semantics<parallel>], iteration_bounds = array<i64: 1>, scalar_prefetch = 0 : i64, scratch_operands = 0 : i64, tpu.core_type = #tpu.core_type<tc>, window_params = [{transform_indices = @transform_0, window_bounds = array<i64: 8, 16>}, {pipeline_mode = #tpu.pipeline_mode<synchronous>, transform_indices = @transform_1, window_bounds = array<i64: 16, 128>}, {pipeline_mode = #tpu.pipeline_mode<synchronous>, transform_indices = @transform_2, window_bounds = array<i64: 1, 128>}, {pipeline_mode = #tpu.pipeline_mode<synchronous>, transform_indices = @transform_3, window_bounds = array<i64: 128, 128>}, {pipeline_mode = #tpu.pipeline_mode<synchronous>, transform_indices = @transform_4, window_bounds = array<i64: 1, 128>}, {transform_indices = @transform_5, window_bounds = array<i64: 8, 128>}, {transform_indices = @transform_6, window_bounds = array<i64: 8, 128>}]} {
    %c0 = arith.constant 0 : index
    %c0_0 = arith.constant 0 : index
    %0 = vector.load %arg1[%c0, %c0_0] : memref<8x16xf32, #tpu.memory_space<vmem>>, vector<8x16xf32>
    %c0_1 = arith.constant 0 : index
    %c0_2 = arith.constant 0 : index
    %1 = vector.load %arg2[%c0_1, %c0_2] : memref<16x128xf32, #tpu.memory_space<vmem>>, vector<16x128xf32>
    %cst = arith.constant dense<0.000000e+00> : vector<8x128xf32>
    %2 = tpu.matmul %0, %1, %cst {dimension_numbers = #tpu.dot_dimension_numbers<[1], [0], [0], [1], [0, 0, 1, 1], [], []>} : vector<8x16xf32>, vector<16x128xf32>, vector<8x128xf32> -> vector<8x128xf32>
    %c0_3 = arith.constant 0 : index
    %c0_4 = arith.constant 0 : index
    %3 = vector.load %arg3[%c0_3, %c0_4] : memref<1x128xf32, #tpu.memory_space<vmem>>, vector<1x128xf32>
    %4 = vector.broadcast %3 : vector<1x128xf32> to vector<8x128xf32>
    %5 = arith.addf %2, %4 : vector<8x128xf32>
    %cst_5 = arith.constant 0.000000e+00 : f32
    %6 = vector.broadcast %cst_5 : f32 to vector<8x128xf32>
    %7 = arith.maximumf %5, %6 : vector<8x128xf32>
    %c0_6 = arith.constant 0 : index
    %c0_7 = arith.constant 0 : index
    %8 = vector.load %arg4[%c0_6, %c0_7] : memref<128x128xf32, #tpu.memory_space<vmem>>, vector<128x128xf32>
    %cst_8 = arith.constant dense<0.000000e+00> : vector<8x128xf32>
    %9 = tpu.matmul %7, %8, %cst_8 {dimension_numbers = #tpu.dot_dimension_numbers<[1], [0], [0], [1], [0, 0, 1, 1], [], []>} : vector<8x128xf32>, vector<128x128xf32>, vector<8x128xf32> -> vector<8x128xf32>
    %c0_9 = arith.constant 0 : index
    %c0_10 = arith.constant 0 : index
    %10 = vector.load %arg5[%c0_9, %c0_10] : memref<1x128xf32, #tpu.memory_space<vmem>>, vector<1x128xf32>
    %11 = vector.broadcast %10 : vector<1x128xf32> to vector<8x128xf32>
    %12 = arith.addf %9, %11 : vector<8x128xf32>
    %c0_11 = arith.constant 0 : index
    %c0_12 = arith.constant 0 : index
    %13 = vector.load %arg7[%c0_11, %c0_12] : memref<8x128xf32, #tpu.memory_space<vmem>>, vector<8x128xf32>
    tpu.vector_store %arg7[%c0_11, %c0_12], %12 {strides = array<i32>} : memref<8x128xf32, #tpu.memory_space<vmem>>, vector<8x128xf32>,
    %cst_13 = arith.constant dense<0xFF800000> : vector<8xf32>
    %14 = vector.multi_reduction <maximumf>, %12, %cst_13 [1] : vector<8x128xf32> to vector<8xf32>
    %15 = vector.shape_cast %14 : vector<8xf32> to vector<8x1xf32>
    %16 = vector.broadcast %15 : vector<8x1xf32> to vector<8x128xf32>
    %17 = arith.subf %12, %16 : vector<8x128xf32>
    %18 = math.exp %17 : vector<8x128xf32>
    %cst_14 = arith.constant dense<0.000000e+00> : vector<8xf32>
    %19 = vector.multi_reduction <add>, %18, %cst_14 [1] : vector<8x128xf32> to vector<8xf32>
    %20 = vector.shape_cast %19 : vector<8xf32> to vector<8x1xf32>
    %21 = tpu.reciprocal %20 {approx = true} : vector<8x1xf32> -> vector<8x1xf32>
    %22 = vector.broadcast %21 : vector<8x1xf32> to vector<8x128xf32>
    %23 = arith.mulf %18, %22 : vector<8x128xf32>
    %c0_15 = arith.constant 0 : index
    %c0_16 = arith.constant 0 : index
    %24 = vector.load %arg6[%c0_15, %c0_16] : memref<8x128xf32, #tpu.memory_space<vmem>>, vector<8x128xf32>
    tpu.vector_store %arg6[%c0_15, %c0_16], %23 {strides = array<i32>} : memref<8x128xf32, #tpu.memory_space<vmem>>, vector<8x128xf32>,
    return
  }
  func.func @transform_0(%arg0: i32) -> (i32, i32) {
    %c0_i32 = arith.constant 0 : i32
    %c0_i32_0 = arith.constant 0 : i32
    return %arg0, %c0_i32 : i32, i32
  }
  func.func @transform_1(%arg0: i32) -> (i32, i32) {
    %c0_i32 = arith.constant 0 : i32
    %c0_i32_0 = arith.constant 0 : i32
    %c0_i32_1 = arith.constant 0 : i32
    return %c0_i32, %c0_i32_0 : i32, i32
  }
  func.func @transform_2(%arg0: i32) -> (i32, i32) {
    %c0_i32 = arith.constant 0 : i32
    %c0_i32_0 = arith.constant 0 : i32
    %c0_i32_1 = arith.constant 0 : i32
    return %c0_i32, %c0_i32_0 : i32, i32
  }
  func.func @transform_3(%arg0: i32) -> (i32, i32) {
    %c0_i32 = arith.constant 0 : i32
    %c0_i32_0 = arith.constant 0 : i32
    %c0_i32_1 = arith.constant 0 : i32
    return %c0_i32, %c0_i32_0 : i32, i32
  }
  func.func @transform_4(%arg0: i32) -> (i32, i32) {
    %c0_i32 = arith.constant 0 : i32
    %c0_i32_0 = arith.constant 0 : i32
    %c0_i32_1 = arith.constant 0 : i32
    return %c0_i32, %c0_i32_0 : i32, i32
  }
  func.func @transform_5(%arg0: i32) -> (i32, i32) {
    %c0_i32 = arith.constant 0 : i32
    %c0_i32_0 = arith.constant 0 : i32
    return %arg0, %c0_i32 : i32, i32
  }
  func.func @transform_6(%arg0: i32) -> (i32, i32) {
    %c0_i32 = arith.constant 0 : i32
    %c0_i32_0 = arith.constant 0 : i32
    return %arg0, %c0_i32 : i32, i32
  }
}

</mosaic_0001>

<bundles_post_ra>
// kernel: tpu_custom_call.1
= control target key start
LH: loop header
LB: loop body
LE: loop exit
PB: predicated region body
PF: predicated region fallthrough
CT: control target
= control target key end

     0   :  { %12 = vsyncpa [#allocation3], 0  ;;  %s623_s0 = inlined_call_operand.hbm [shape: f32[8,16], index: 0, kind: input, shape index: {}]   ;;  %s624_s1 = inlined_call_operand.hbm [shape: f32[16,128], index: 1, kind: input, shape index: {}]   ;;  %s625_s2 = inlined_call_operand.vmem [shape: f32[1,128], index: 2, kind: input, shape index: {}]   ;;  %s626_s3 = inlined_call_operand.hbm [shape: f32[128,128], index: 3, kind: input, shape index: {}]   ;;  %s627_s4 = inlined_call_operand.vmem [shape: f32[1,128], index: 4, kind: input, shape index: {}]   ;;  %s628_s5 = inlined_call_operand.hbm [shape: f32[8,128], index: 5, kind: output, shape index: {0}]   ;;  %s629_s6 = inlined_call_operand.hbm [shape: f32[8,128], index: 6, kind: output, shape index: {1}]  }
   0x1   :  { %13 = vsyncpa [#allocation6], 0 }
   0x2   :  { %14 = vsyncpa [#allocation4], 0 }
   0x3   :  { %15 = vsyncpa [#allocation10], 0  ;;  %s506_s21 = smov [#allocation5]   ;;  %s388_s25 = scalar_lea.hbm %s624_s1, 256 }
   0x4   :  { %s31_s22 = sshll.u32 %s506_s21, 4  ;;  %p389_p0 = scmp.ne.s32.totalorder %s624_s1, %s388_s25  ;;  %s32_s22 = int_to_ptr.vmem [resolvable:$true] %s31_s22 }
   0x5   :  { %p392_p1 = scmp.lt.u32.totalorder %s388_s25, %s624_s1 }
   0x7   :  { %p394_p2 = pnand %p392_p1, %p389_p0 }
   0x9   :  { %397 = shalt.err (!%p394_p2)
}
   0xa   :  { %s398_s30 = scalar_lea.vmem %s32_s22, 256  ;;  %p403_p4 = scmp.lt.s32.totalorder %s32_s22, %s32_s22 }
   0xb   :  { %p399_p3 = scmp.ne.s32.totalorder %s32_s22, %s398_s30  ;;  %p404_p5 = scmp.lt.s32.totalorder %s398_s30, %s398_s30 }
   0xd   :  { %p405_p6 = por %p404_p5, %p403_p4 }
   0xf   :  { %p406_p7 = pnand %p405_p6, %p399_p3 }
  0x11   :  { %409 = shalt.err (!%p406_p7)
}
  0x12   :  { %s507_s7 = smov 128   ;;  %s508_s8 = smov 8  }
  0x13   :  { %37 = dma.hbm_to_vmem [thread:$0]  %s624_s1, 256, %s32_s22, [#allocation6], %s507_s7, %s507_s7, %s508_s8  }
  0x14   :  { %s509_s11 = smov [#allocation2]   ;;  %s510_s13 = smov [#allocation7]  }
  0x15   :  { %s22_s12 = sshll.u32 %s509_s11, 4  ;;  %s45_s14 = sshll.u32 %s510_s13, 4  ;;  %s23_s12 = int_to_ptr.vmem [resolvable:$true] %s22_s12  ;;  %s46_s14 = int_to_ptr.vmem [resolvable:$true] %s45_s14 }
  0x16   :  { %s410_s17 = scalar_lea.hbm %s623_s0, 128 }
  0x17   :  { %p411_p8 = scmp.ne.s32.totalorder %s623_s0, %s410_s17  ;;  %p414_p9 = scmp.lt.u32.totalorder %s410_s17, %s623_s0 }
  0x19   :  { %p416_p10 = pnand %p414_p9, %p411_p8 }
  0x1b   :  { %419 = shalt.err (!%p416_p10)
}
  0x1c   :  { %s420_s1 = scalar_lea.vmem %s23_s12, 128  ;;  %p425_p12 = scmp.lt.s32.totalorder %s23_s12, %s23_s12 }
  0x1d   :  { %p421_p11 = scmp.ne.s32.totalorder %s23_s12, %s420_s1  ;;  %p426_p13 = scmp.lt.s32.totalorder %s420_s1, %s420_s1 }
  0x1f   :  { %p427_p0 = por %p426_p13, %p425_p12 }
  0x21   :  { %p428_p1 = pnand %p427_p0, %p421_p11 }
  0x23   :  { %431 = shalt.err (!%p428_p1)
}
  0x24   :  { %25 = dma.hbm_to_vmem [thread:$0]  %s623_s0, 128, %s23_s12, [#allocation3]  }
  0x25   :  { %s432_s26 = scalar_lea.hbm %s626_s3, 2048 }
  0x26   :  { %p433_p2 = scmp.ne.s32.totalorder %s626_s3, %s432_s26  ;;  %p436_p3 = scmp.lt.u32.totalorder %s432_s26, %s626_s3 }
  0x28   :  { %p438_p4 = pnand %p436_p3, %p433_p2 }
  0x2a   :  { %441 = shalt.err (!%p438_p4)
}
  0x2b   :  { %s442_s9 = scalar_lea.vmem %s46_s14, 2048  ;;  %p447_p6 = scmp.lt.s32.totalorder %s46_s14, %s46_s14 }
  0x2c   :  { %p443_p5 = scmp.ne.s32.totalorder %s46_s14, %s442_s9  ;;  %p448_p7 = scmp.lt.s32.totalorder %s442_s9, %s442_s9 }
  0x2e   :  { %p449_p8 = por %p448_p7, %p447_p6 }
  0x30   :  { %p450_p9 = pnand %p449_p8, %p443_p5 }
  0x32   :  { %453 = shalt.err (!%p450_p9)
}
  0x33   :  { %51 = dma.hbm_to_vmem [thread:$0]  %s626_s3, 2048, %s46_s14, [#allocation6], %s507_s7, %s507_s7, %s508_s8  }
  0x34   :  { %498 = dma.done.wait [#allocation3], 128  }
  0x35   :  { %499 = vsyncadd [#allocation3], 4294967168 }
  0x36   :  { %500 = dma.done.wait [#allocation6], 2304  }
  0x37   :  { %501 = vsyncadd [#allocation6], 4294964992  ;;  %v511_v0 = vmov 0.0|0.0   ;;  %vm512_vm0 = vmmov 0   ;;  %v513_v1 = vmov 0.0   ;;  %v64_v2 = vld [vmem:[#allocation5] sm:$0xff] }
  0x38   :  { %347 = vmatprep.subr.bf16.mxu0 %v511_v0  ;;  %309 = vmatprep.mubr.msk.f32.mxu0 %vm512_vm0, %v513_v1  ;;  %v65_v3 = vld [vmem:[#allocation5 + $0x8] sm:$0xff]  ;;  %v148_v5 = vld [vmem:[#allocation7] sm:$0xff]  ;;  %v149_v6 = vld [vmem:[#allocation7 + $0x8] sm:$0xff]  ;;  %vm73_vm1 = vcmask 130048  }
  0x39   :  { %350 = vmatprep.subr.bf16.mxu1 %v511_v0  ;;  %344 = vmatprep.mubr.msk.f32.mxu1 %vm512_vm0, %v513_v1  ;;  %v348_v4 = vpack.c.bf16 %v65_v3, %v64_v2  ;;  %v150_v7 = vld [vmem:[#allocation7 + $0x10] sm:$0xff]  ;;  %v351_v8 = vpack.c.bf16 %v149_v6, %v148_v5  ;;  %v151_v9 = vld [vmem:[#allocation7 + $0x18] sm:$0xff]  ;;  %v63_v10 = vld [vmem:[#allocation2] sm:$0xff] }
  0x3a   :  { %v354_v11 = vpack.c.bf16 %v151_v9, %v150_v7  ;;  %v152_v12 = vld [vmem:[#allocation7 + $0x20] sm:$0xff]  ;;  %v153_v13 = vld [vmem:[#allocation7 + $0x28] sm:$0xff]  ;;  %v154_v15 = vld [vmem:[#allocation7 + $0x30] sm:$0xff] }
  0x3b   :  { %349 = vmatpush3.bf16.msra.mxu0 %v348_v4  ;;  %352 = vmatpush3.bf16.msra.mxu1 %v351_v8  ;;  %v357_v14 = vpack.c.bf16 %v153_v13, %v152_v12  ;;  %v155_v16 = vld [vmem:[#allocation7 + $0x38] sm:$0xff]  ;;  %v156_v18 = vld [vmem:[#allocation7 + $0x40] sm:$0xff]  ;;  %v157_v19 = vld [vmem:[#allocation7 + $0x48] sm:$0xff] }
  0x3c   :  { %353 = vmatprep.subr.bf16.mxu1 %v511_v0  ;;  %v360_v17 = vpack.c.bf16 %v155_v16, %v154_v15  ;;  %v363_v20 = vpack.c.bf16 %v157_v19, %v156_v18  ;;  %v158_v21 = vld [vmem:[#allocation7 + $0x50] sm:$0xff]  ;;  %v159_v22 = vld [vmem:[#allocation7 + $0x58] sm:$0xff]  ;;  %v160_v24 = vld [vmem:[#allocation7 + $0x60] sm:$0xff] }
  0x3d   :  { %v366_v23 = vpack.c.bf16 %v159_v22, %v158_v21  ;;  %v161_v25 = vld [vmem:[#allocation7 + $0x68] sm:$0xff]  ;;  %v162_v27 = vld [vmem:[#allocation7 + $0x70] sm:$0xff]  ;;  %v163_v28 = vld [vmem:[#allocation7 + $0x78] sm:$0xff] }
  0x3e   :  { %310 = vmatmul.mubr.msk.f32.vlgmr.msra.gmra.mrb[0].mxu0 %vm73_vm1, %v63_v10  ;;  %v369_v26 = vpack.c.bf16 %v161_v25, %v160_v24  ;;  %v372_v29 = vpack.c.bf16 %v163_v28, %v162_v27  ;;  %v282_v30 = vld [vmem:[%s625_s2] ss:$0 sm:$0xff]  ;;  %s514_s2 = smov [#allocation9]  }
  0x3f   :  { %355 = vmatpush3.bf16.msra.mxu1 %v354_v11  ;;  %v284_v35 = vld [vmem:[%s627_s4] ss:$0 sm:$0xff]  ;;  %s268_s12 = sshll.u32 %s514_s2, 4  ;;  %s269_s12 = int_to_ptr.vmem [resolvable:$true] %s268_s12 }
  0x40   :  { %356 = vmatprep.subr.bf16.mxu1 %v511_v0  ;;  %s454_s13 = scalar_lea.vmem %s269_s12, 128  ;;  %p459_p11 = scmp.lt.s32.totalorder %s269_s12, %s269_s12 }
  0x41   :  { %p455_p10 = scmp.ne.s32.totalorder %s269_s12, %s454_s13  ;;  %p460_p12 = scmp.lt.s32.totalorder %s454_s13, %s454_s13 }
  0x43   :  { %358 = vmatpush3.bf16.msra.mxu1 %v357_v14  ;;  %p461_p13 = por %p460_p12, %p459_p11 }
  0x44   :  { %359 = vmatprep.subr.bf16.mxu1 %v511_v0 }
  0x45   :  { %p462_p0 = pnand %p461_p13, %p455_p10 }
  0x47   :  { %361 = vmatpush3.bf16.msra.mxu1 %v360_v17 }
  0x48   :  { %362 = vmatprep.subr.bf16.mxu1 %v511_v0 }
  0x4b   :  { %364 = vmatpush3.bf16.msra.mxu1 %v363_v20 }
  0x4c   :  { %365 = vmatprep.subr.bf16.mxu1 %v511_v0 }
  0x4f   :  { %367 = vmatpush3.bf16.msra.mxu1 %v366_v23 }
  0x50   :  { %368 = vmatprep.subr.bf16.mxu1 %v511_v0 }
  0x53   :  { %370 = vmatpush3.bf16.msra.mxu1 %v369_v26 }
  0x54   :  { %371 = vmatprep.subr.bf16.mxu1 %v511_v0 }
  0x57   :  { %373 = vmatpush3.bf16.msra.mxu1 %v372_v29 }
 0x111   :  { %v143_v31 = vpop.f32.mrb[0].mxu0 }
 0x112   :  { %v144_v32 = vadd.f32 %v282_v30, %v143_v31  ;;  %v311_v33 = vpop.f32.mrb[1].mxu0 }
 0x114   :  { %v147_v34 = vmax.f32 %v144_v32, 0.0 }
 0x116   :  { %345 = vmatmul.mubr.f32.vlgmr.msra.gmra.mrb[0].mxu1 %v147_v34 }
 0x1e9   :  { %v237_v36 = vpop.f32.mrb[0].mxu1 }
 0x1ea   :  { %v238_v37 = vadd.f32 %v284_v35, %v237_v36  ;;  %v346_v38 = vpop.f32.mrb[1].mxu1 }
 0x1ec   :  { %241 = vst [vmem:[#allocation9] sm:$0xff] %v238_v37  ;;  %242 = vmax.xlane.f32.xlu0 %v238_v37 }
 0x279   :  { %v243_v39 = vpop.xlane.xlu0 %242 }
 0x27a   :  { %v244_v40 = vsub.f32 %v238_v37, %v243_v39 }
 0x27c   :  { %v245_v41 = vmul.f32 1.442695, %v244_v40 }
 0x27e   :  { %384 = vpow2.f32 %v245_v41 }
 0x288   :  { %v385_v42 = vpop.eup %384 }
 0x289   :  { %247 = vadd.xlane.f32.xlu0 %v385_v42 }
 0x28a   :  { %465 = shalt.err (!%p462_p0)
}
 0x28b   :  { %s466_s15 = scalar_lea.hbm %s629_s6, 128 }
 0x28c   :  { %p467_p1 = scmp.ne.s32.totalorder %s629_s6, %s466_s15  ;;  %p470_p2 = scmp.lt.u32.totalorder %s466_s15, %s629_s6 }
 0x28e   :  { %p472_p3 = pnand %p470_p2, %p467_p1 }
 0x290   :  { %475 = shalt.err (!%p472_p3)
}
 0x291   :  { %271 = dma.vmem_to_hbm [thread:$0]  %s269_s12, 128, %s629_s6, [#allocation10]  }
 0x292   :  { %s515_s1 = smov [#allocation8]  }
 0x293   :  { %s258_s22 = sshll.u32 %s515_s1, 4  ;;  %s259_s22 = int_to_ptr.vmem [resolvable:$true] %s258_s22 }
 0x294   :  { %s476_s23 = scalar_lea.vmem %s259_s22, 128  ;;  %p481_p5 = scmp.lt.s32.totalorder %s259_s22, %s259_s22 }
 0x295   :  { %p477_p4 = scmp.ne.s32.totalorder %s259_s22, %s476_s23  ;;  %p482_p6 = scmp.lt.s32.totalorder %s476_s23, %s476_s23 }
 0x297   :  { %p483_p7 = por %p482_p6, %p481_p5 }
 0x299   :  { %p484_p8 = pnand %p483_p7, %p477_p4 }
 0x316   :  { %v248_v43 = vpop.xlane.xlu0 %247 }
 0x317   :  { %386 = vrcp.f32 %v248_v43 }
 0x321   :  { %v387_v44 = vpop.eup %386 }
 0x322   :  { %v250_v45 = vmul.f32 %v387_v44, %v385_v42 }
 0x324   :  { %251 = vst [vmem:[#allocation8] sm:$0xff] %v250_v45 }
 0x325   :  { %487 = shalt.err (!%p484_p8)
}
 0x326   :  { %s488_s26 = scalar_lea.hbm %s628_s5, 128 }
 0x327   :  { %p489_p9 = scmp.ne.s32.totalorder %s628_s5, %s488_s26  ;;  %p492_p10 = scmp.lt.u32.totalorder %s488_s26, %s628_s5 }
 0x329   :  { %p494_p11 = pnand %p492_p10, %p489_p9 }
 0x32b   :  { %497 = shalt.err (!%p494_p11)
}
 0x32c   :  { %261 = dma.vmem_to_hbm [thread:$0]  %s259_s22, 128, %s628_s5, [#allocation4]  }
 0x32d   :  { %502 = dma.done.wait [#allocation4], 128  }
 0x32e   :  { %503 = vsyncadd [#allocation4], 4294967168 }
 0x32f   :  { %504 = dma.done.wait [#allocation10], 128  }
 0x330   :  { %505 = vsyncadd [#allocation10], 4294967168 }
 0x331   :  { %278 = vsyncpa [#allocation3], 1 }
 0x332   :  { %279 = vsyncpa [#allocation6], 1 }
 0x333   :  { %280 = vsyncpa [#allocation4], 1 }
 0x334   :  { %281 = vsyncpa [#allocation10], 1 }

</bundles_post_ra>
